<compile_context>
chip_gen: v7x
topology: tpu7x:2x2x1
jax: 0.10.0
libtpu: 0.0.40
codegen_flags: <defaults>
</compile_context>

<pallas_src>
import functools

import jax
import jax.numpy as jnp
from jax import lax
from jax.experimental import pallas as pl
from jax.experimental.pallas import tpu as pltpu

KS, STRIDE, PAD = 4, 2, 1
LEAKY_SLOPE = 0.2
BN_EPS = 1e-5
LANES = 128            # matmul output channels are padded to a multiple of this


def _round_up(x, m):
    return (x + m - 1) // m * m


# ---------------------------------------------------------------------------
# Grouped tiled bf16 matmul (f32 accumulator) on the MXU.
#   a: (G, M, K)  @  b: (G, K, N)  ->  o: (G, M, Np)     (Np = round_up(N,128))
# Optional fused ReLU epilogue; optional fused per-column (sum, sum-of-squares)
# statistics, accumulated in VMEM scratch and emitted once per (g, N-tile).
# ---------------------------------------------------------------------------
def _mm_kernel(a_ref, b_ref, o_ref, acc_ref, *, relu):
    @pl.when(pl.program_id(3) == 0)
    def _():
        acc_ref[...] = jnp.zeros_like(acc_ref)

    acc_ref[...] += jnp.dot(a_ref[...], b_ref[...],
                            preferred_element_type=jnp.float32)

    @pl.when(pl.program_id(3) == pl.num_programs(3) - 1)
    def _():
        acc = acc_ref[...]
        if relu:                      # fused activation, free VPU work
            acc = jnp.maximum(acc, 0.0)
        o_ref[...] = acc.astype(o_ref.dtype)


def _mm_stats_kernel(a_ref, b_ref, o_ref, s_ref, q_ref, acc_ref, s_sc, q_sc):
    # grid order is (g, j, i, k); stats accumulate over (i, k) per (g, j)
    # in VMEM scratch and are stored exactly once at the last (i, k) step.
    i, k = pl.program_id(2), pl.program_id(3)
    ni_, nk_ = pl.num_programs(2), pl.num_programs(3)

    @pl.when((i == 0) & (k == 0))
    def _():
        s_sc[...] = jnp.zeros_like(s_sc)
        q_sc[...] = jnp.zeros_like(q_sc)

    @pl.when(k == 0)
    def _():
        acc_ref[...] = jnp.zeros_like(acc_ref)

    acc_ref[...] += jnp.dot(a_ref[...], b_ref[...],
                            preferred_element_type=jnp.float32)

    @pl.when(k == nk_ - 1)
    def _():
        acc = acc_ref[...]
        o_ref[...] = acc.astype(o_ref.dtype)
        s_sc[...] += jnp.sum(acc, axis=0, keepdims=True)
        q_sc[...] += jnp.sum(acc * acc, axis=0, keepdims=True)

    @pl.when((i == ni_ - 1) & (k == nk_ - 1))
    def _():
        s_ref[...] = jnp.broadcast_to(s_sc[...], s_ref.shape)
        q_ref[...] = jnp.broadcast_to(q_sc[...], q_ref.shape)


def grouped_matmul(a, b, *, out_dtype=jnp.bfloat16, relu=False,
                   with_stats=False, tm=1024, tk=1024):
    """bf16 (G,M,K)@(G,K,N) on the MXU, tiled + pipelined, f32 accumulator.

    Returns o[:, :M] with N zero-padded to a multiple of 128.  If
    `with_stats`, also returns per-output-channel (sum, sum_of_squares)
    over all G*M real rows, accumulated inside the matmul.
    """
    G, M, K = a.shape
    G2, K2, N = b.shape
    assert G == G2 and K == K2
    a = a.astype(jnp.bfloat16)
    b = b.astype(jnp.bfloat16)

    Np = _round_up(N, LANES)
    tn = next(t for t in (512, 256, 128) if Np % t == 0)
    if Np != N:
        b = jnp.pad(b, ((0, 0), (0, 0), (0, Np - N)))   # zero cols -> zero out

    tm_e = min(tm, _round_up(M, 8))
    Mp = _round_up(M, tm_e)
    if Mp != M:
        a = jnp.pad(a, ((0, 0), (0, Mp - M), (0, 0)))   # zero rows: stats ok

    if K <= tk:
        tk_e, Kp = K, K                                  # single full-K block
    else:
        tk_e = tk
        Kp = _round_up(K, tk_e)
        a = jnp.pad(a, ((0, 0), (0, 0), (0, Kp - K)))
        b = jnp.pad(b, ((0, 0), (0, Kp - K), (0, 0)))

    mt, nt, kt = Mp // tm_e, Np // tn, Kp // tk_e
    acc_scratch = pltpu.VMEM((tm_e, tn), jnp.float32)
    cp_kwargs = dict(vmem_limit_bytes=32 * 1024 * 1024)

    if not with_stats:
        out = pl.pallas_call(
            functools.partial(_mm_kernel, relu=relu),
            out_shape=jax.ShapeDtypeStruct((G, Mp, Np), out_dtype),
            grid=(G, mt, nt, kt),
            in_specs=[
                pl.BlockSpec((None, tm_e, tk_e), lambda g, i, j, k: (g, i, k)),
                pl.BlockSpec((None, tk_e, tn), lambda g, i, j, k: (g, k, j)),
            ],
            out_specs=pl.BlockSpec((None, tm_e, tn),
                                   lambda g, i, j, k: (g, i, j)),
            scratch_shapes=[acc_scratch],
            compiler_params=pltpu.CompilerParams(
                dimension_semantics=("parallel", "parallel", "parallel",
                                     "arbitrary"), **cp_kwargs),
        )(a, b)
        return out[:, :M]

    # Stats variant: grid (g, j, i, k) so that, for each (g, j), the (i, k)
    # iterations are consecutive and column sums can live in VMEM scratch.
    out, s, q = pl.pallas_call(
        _mm_stats_kernel,
        out_shape=(
            jax.ShapeDtypeStruct((G, Mp, Np), out_dtype),
            jax.ShapeDtypeStruct((G, 8, Np), jnp.float32),
            jax.ShapeDtypeStruct((G, 8, Np), jnp.float32),
        ),
        grid=(G, nt, mt, kt),
        in_specs=[
            pl.BlockSpec((None, tm_e, tk_e), lambda g, j, i, k: (g, i, k)),
            pl.BlockSpec((None, tk_e, tn), lambda g, j, i, k: (g, k, j)),
        ],
        out_specs=(
            pl.BlockSpec((None, tm_e, tn), lambda g, j, i, k: (g, i, j)),
            pl.BlockSpec((None, 8, tn), lambda g, j, i, k: (g, 0, j)),
            pl.BlockSpec((None, 8, tn), lambda g, j, i, k: (g, 0, j)),
        ),
        scratch_shapes=[acc_scratch,
                        pltpu.VMEM((1, tn), jnp.float32),
                        pltpu.VMEM((1, tn), jnp.float32)],
        compiler_params=pltpu.CompilerParams(
            dimension_semantics=("parallel", "parallel", "arbitrary",
                                 "arbitrary"), **cp_kwargs),
    )(a, b)
    col_sum = s[:, 0, :].sum(axis=0)     # tiny (G, Np) reductions on host side
    col_sq = q[:, 0, :].sum(axis=0)
    return out[:, :M], col_sum, col_sq


# ---------------------------------------------------------------------------
# Lane-dense per-channel affine (BatchNorm apply): bf16 in, f32 compute/out.
# ---------------------------------------------------------------------------
def _scale_shift_kernel(y_ref, sc_ref, sh_ref, o_ref):
    o_ref[...] = y_ref[...].astype(jnp.float32) * sc_ref[...] + sh_ref[...]


def scale_shift_grouped(y, scale, shift, *, tm=1024):
    """y[G, M, Cpad] * scale[Cpad] + shift[Cpad], channels-last, tiled rows."""
    G, M, C = y.shape
    tm_e = min(tm, _round_up(M, 8))
    Mp = _round_up(M, tm_e)
    if Mp != M:
        y = jnp.pad(y, ((0, 0), (0, Mp - M), (0, 0)))
    out = pl.pallas_call(
        _scale_shift_kernel,
        out_shape=jax.ShapeDtypeStruct((G, Mp, C), jnp.float32),
        grid=(G, Mp // tm_e),
        in_specs=[
            pl.BlockSpec((None, tm_e, C), lambda g, i: (g, i, 0)),
            pl.BlockSpec((1, C), lambda g, i: (0, 0)),
            pl.BlockSpec((1, C), lambda g, i: (0, 0)),
        ],
        out_specs=pl.BlockSpec((None, tm_e, C), lambda g, i: (g, i, 0)),
        compiler_params=pltpu.CompilerParams(
            dimension_semantics=("parallel", "parallel")),
    )(y, scale.reshape(1, C).astype(jnp.float32),
      shift.reshape(1, C).astype(jnp.float32))
    return out[:, :M]


# ConvTranspose2d(k=4, s=2, p=1) output-phase decomposition.  Output row
# 2m+py gets contributions from (kernel row ky, offset ro into the 1-zero-
# padded input, ro = iy + 1 - m):
#   py=0: (ky=1, ro=1), (ky=3, ro=0)
#   py=1: (ky=0, ro=2), (ky=2, ro=1)
# Columns are identical.
_PHASE_TAPS = (((1, 1), (3, 0)), ((0, 2), (2, 1)))


def unet_block_innermost(x, w_down, w_up, gamma, beta):
    """Innermost UnetBlock: cat([x, BN(ConvT(ReLU(Conv(LeakyReLU(x)))))], 1)."""
    N, C, H, W = x.shape
    ni = w_down.shape[0]              # Conv2d weight (ni, C, 4, 4)
    nf = w_up.shape[1]                # ConvTranspose2d weight (ni, nf, 4, 4)
    ni_pad = _round_up(ni, LANES)
    nf_pad = _round_up(nf, LANES)
    OH = (H + 2 * PAD - KS) // STRIDE + 1
    OW = (W + 2 * PAD - KS) // STRIDE + 1
    Mu = N * OH * OW

    # ---- down: LeakyReLU -> Conv2d(C->ni, 4, 2, 1), ReLU fused in epilogue
    x_nhwc = jnp.transpose(x, (0, 2, 3, 1))
    xa = jnp.where(x_nhwc >= 0, x_nhwc,
                   LEAKY_SLOPE * x_nhwc).astype(jnp.bfloat16)
    xp = jnp.pad(xa, ((0, 0), (PAD, PAD), (PAD, PAD), (0, 0)))
    # im2col with (kh, kw, C) ordering, channels minor: each tap slab is a
    # plain strided slice of the NHWC input (no kw-minor relayout).
    # TODO(synk): fuse patch extraction into the matmul (manual DMA /
    # element-offset index_map) so the expanded patches never hit HBM.
    cols = [xp[:, i:i + STRIDE * OH:STRIDE, j:j + STRIDE * OW:STRIDE, :]
            for i in range(KS) for j in range(KS)]
    a_dn = jnp.stack(cols, axis=3).reshape(1, Mu, KS * KS * C)
    b_dn = jnp.transpose(w_down, (2, 3, 1, 0)).reshape(1, KS * KS * C, ni)
    h = grouped_matmul(a_dn, b_dn, out_dtype=jnp.bfloat16, relu=True)
    hr = h[0].reshape(N, OH, OW, ni_pad)     # ReLU'd, channels kept 128-padded

    # ---- up: ConvTranspose2d(ni->nf, 4, 2, 1), 4 stride-2 output phases
    # folded into ONE grouped matmul via a leading group axis of size 4.
    hp = jnp.pad(hr, ((0, 0), (1, 1), (1, 1), (0, 0)))          # zero halo
    phases = ((0, 0), (0, 1), (1, 0), (1, 1))
    a_up = []
    for py, px in phases:
        slabs = [hp[:, ro:ro + OH, co:co + OW, :]               # (N,OH,OW,ni_pad)
                 for _, ro in _PHASE_TAPS[py] for _, co in _PHASE_TAPS[px]]
        a_up.append(jnp.concatenate(slabs, axis=-1).reshape(Mu, 4 * ni_pad))
    a_up = jnp.stack(a_up, axis=0)                              # (4, Mu, 4*ni_pad)

    b_up = jnp.zeros((4, 4 * ni_pad, nf_pad), jnp.float32)
    for p, (py, px) in enumerate(phases):
        t = 0
        for ky, _ in _PHASE_TAPS[py]:
            for kx, _ in _PHASE_TAPS[px]:
                b_up = b_up.at[p, t * ni_pad:t * ni_pad + ni, :nf].set(
                    w_up[:, :, ky, kx])
                t += 1

    y_all, col_sum, col_sq = grouped_matmul(
        a_up, b_up, out_dtype=jnp.bfloat16, with_stats=True)    # (4, Mu, nf_pad)

    # ---- BatchNorm2d(nf): training-mode batch stats (fused into the matmul)
    count = 4.0 * Mu                                            # all phases, real rows
    mean = col_sum / count
    var = jnp.maximum(col_sq / count - mean * mean, 0.0)
    # TODO(synk): use a shifted/Welford accumulator for production-scale
    # activations (single-pass E[x^2]-E[x]^2 can cancel catastrophically).
    g_pad = jnp.zeros((nf_pad,), jnp.float32).at[:nf].set(
        gamma.reshape(-1).astype(jnp.float32))
    b_pad = jnp.zeros((nf_pad,), jnp.float32).at[:nf].set(
        beta.reshape(-1).astype(jnp.float32))
    scale = g_pad * lax.rsqrt(var + BN_EPS)
    shift = b_pad - mean * scale

    y_bn = scale_shift_grouped(y_all, scale, shift)             # (4, Mu, nf_pad) f32

    # ---- interleave the 4 phases -> (N, nf, 2OH, 2OW), concat skip input
    # TODO(synk): write BN-applied phases straight into the strided NCHW half
    # of the concatenated output via an out_specs index_map to drop this pass.
    yb = y_bn[:, :, :nf].reshape(2, 2, N, OH, OW, nf)
    y = yb.transpose(2, 5, 3, 0, 4, 1).reshape(N, nf, 2 * OH, 2 * OW)
    return jnp.concatenate([x, y], axis=1)                      # (N, C+nf, H, W)


# ---------------------------------------------------------------------------
# Pure-JAX f32 reference of the same forward (for a loose numeric check)
# ---------------------------------------------------------------------------
def _reference_forward(x, w_down, w_up, gamma, beta):
    dn = ("NCHW", "OIHW", "NCHW")
    xa = jnp.where(x >= 0, x, LEAKY_SLOPE * x)
    h = lax.conv_general_dilated(
        xa, w_down, window_strides=(STRIDE, STRIDE),
        padding=((PAD, PAD), (PAD, PAD)), dimension_numbers=dn,
        precision=lax.Precision.HIGHEST)
    hr = jnp.maximum(h, 0.0)
    w_conv = jnp.flip(w_up, axis=(2, 3)).transpose(1, 0, 2, 3)
    q = KS - 1 - PAD
    y = lax.conv_general_dilated(
        hr, w_conv, window_strides=(1, 1), padding=((q, q), (q, q)),
        lhs_dilation=(STRIDE, STRIDE), dimension_numbers=dn,
        precision=lax.Precision.HIGHEST)
    mean = y.mean(axis=(0, 2, 3), keepdims=True)
    var = ((y - mean) ** 2).mean(axis=(0, 2, 3), keepdims=True)
    yn = (y - mean) * lax.rsqrt(var + BN_EPS)
    yn = yn * gamma.reshape(1, -1, 1, 1) + beta.reshape(1, -1, 1, 1)
    return jnp.concatenate([x, yn], axis=1)


# ---------------------------------------------------------------------------
if __name__ == "__main__":
    key = jax.random.PRNGKey(0)
    k1, k2, k3, k4, kx = jax.random.split(key, 5)

    # innermost UnetBlock(nf=4, ni=8): input_channels defaults to nf.
    nf, ni = 4, 8
    N, H, W = 2, 16, 16

    x = jax.random.normal(kx, (N, nf, H, W), dtype=jnp.float32)
    w_down = 0.1 * jax.random.normal(k1, (ni, nf, KS, KS), dtype=jnp.float32)
    w_up = 0.1 * jax.random.normal(k2, (ni, nf, KS, KS), dtype=jnp.float32)
    gamma = 1.0 + 0.1 * jax.random.normal(k3, (nf,), dtype=jnp.float32)
    beta = 0.1 * jax.random.normal(k4, (nf,), dtype=jnp.float32)

    out = jax.jit(unet_block_innermost)(x, w_down, w_up, gamma, beta)
    out = jax.block_until_ready(out)

    assert out.shape == (N, nf + nf, H, W), out.shape
    assert bool(jnp.all(jnp.isfinite(out)))

    ref = _reference_forward(x, w_down, w_up, gamma, beta)
    max_err = float(jnp.max(jnp.abs(out - ref)))
    assert max_err < 0.25, f"max abs error vs f32 reference: {max_err}"

    print("KERNEL_OK")
</pallas_src>

<mosaic_0001>
module attributes {stable_mosaic.version = 11 : i64} {
  func.func @_mm_kernel(%arg0: i32, %arg1: i32, %arg2: i32, %arg3: i32, %arg4: memref<1x128x64xbf16, #tpu.memory_space<vmem>>, %arg5: memref<1x64x128xbf16, #tpu.memory_space<vmem>>, %arg6: memref<1x128x128xbf16, #tpu.memory_space<vmem>>, %arg7: memref<128x128xf32, #tpu.memory_space<vmem>>) attributes {dimension_semantics = [#tpu.dimension_semantics<parallel>, #tpu.dimension_semantics<parallel>, #tpu.dimension_semantics<parallel>, #tpu.dimension_semantics<arbitrary>], iteration_bounds = array<i64: 1, 1, 1, 1>, scalar_prefetch = 0 : i64, scratch_operands = 1 : i64, tpu.core_type = #tpu.core_type<tc>, window_params = [{transform_indices = @transform_0, window_bounds = array<i64: 1, 128, 64>}, {transform_indices = @transform_1, window_bounds = array<i64: 1, 64, 128>}, {transform_indices = @transform_2, window_bounds = array<i64: 1, 128, 128>}]} {
    %c0_i32 = arith.constant 0 : i32
    %0 = arith.cmpi eq, %arg3, %c0_i32 : i32
    %1 = arith.extui %0 : i1 to i32
    %c0_i32_0 = arith.constant 0 : i32
    %2 = arith.cmpi ne, %1, %c0_i32_0 : i32
    scf.if %2 {
      %cst_12 = arith.constant 0.000000e+00 : f32
      %14 = vector.broadcast %cst_12 : f32 to vector<128x128xf32>
      %c0_13 = arith.constant 0 : index
      %c0_14 = arith.constant 0 : index
      %15 = vector.load %arg7[%c0_13, %c0_14] : memref<128x128xf32, #tpu.memory_space<vmem>>, vector<128x128xf32>
      tpu.vector_store %arg7[%c0_13, %c0_14], %14 {strides = array<i32>} : memref<128x128xf32, #tpu.memory_space<vmem>>, vector<128x128xf32>,
    } else {
    }
    %c0 = arith.constant 0 : index
    %c0_1 = arith.constant 0 : index
    %3 = vector.load %arg7[%c0, %c0_1] : memref<128x128xf32, #tpu.memory_space<vmem>>, vector<128x128xf32>
    %c0_2 = arith.constant 0 : index
    %c0_3 = arith.constant 0 : index
    %c0_4 = arith.constant 0 : index
    %4 = vector.load %arg4[%c0_2, %c0_3, %c0_4] : memref<1x128x64xbf16, #tpu.memory_space<vmem>>, vector<1x128x64xbf16>
    %5 = vector.shape_cast %4 : vector<1x128x64xbf16> to vector<128x64xbf16>
    %c0_5 = arith.constant 0 : index
    %c0_6 = arith.constant 0 : index
    %c0_7 = arith.constant 0 : index
    %6 = vector.load %arg5[%c0_5, %c0_6, %c0_7] : memref<1x64x128xbf16, #tpu.memory_space<vmem>>, vector<1x64x128xbf16>
    %7 = vector.shape_cast %6 : vector<1x64x128xbf16> to vector<64x128xbf16>
    %cst = arith.constant dense<0.000000e+00> : vector<128x128xf32>
    %8 = tpu.matmul %5, %7, %cst {dimension_numbers = #tpu.dot_dimension_numbers<[1], [0], [0], [1], [0, 0, 1, 1], [], []>} : vector<128x64xbf16>, vector<64x128xbf16>, vector<128x128xf32> -> vector<128x128xf32>
    %9 = arith.addf %3, %8 : vector<128x128xf32>
    %c0_8 = arith.constant 0 : index
    %c0_9 = arith.constant 0 : index
    %10 = vector.load %arg7[%c0_8, %c0_9] : memref<128x128xf32, #tpu.memory_space<vmem>>, vector<128x128xf32>
    tpu.vector_store %arg7[%c0_8, %c0_9], %9 {strides = array<i32>} : memref<128x128xf32, #tpu.memory_space<vmem>>, vector<128x128xf32>,
    %c0_i32_10 = arith.constant 0 : i32
    %11 = arith.cmpi eq, %arg3, %c0_i32_10 : i32
    %12 = arith.extui %11 : i1 to i32
    %c0_i32_11 = arith.constant 0 : i32
    %13 = arith.cmpi ne, %12, %c0_i32_11 : i32
    scf.if %13 {
      %c0_12 = arith.constant 0 : index
      %c0_13 = arith.constant 0 : index
      %14 = vector.load %arg7[%c0_12, %c0_13] : memref<128x128xf32, #tpu.memory_space<vmem>>, vector<128x128xf32>
      %cst_14 = arith.constant 0.000000e+00 : f32
      %15 = vector.broadcast %cst_14 : f32 to vector<128x128xf32>
      %16 = arith.maximumf %14, %15 : vector<128x128xf32>
      %17 = arith.truncf %16 : vector<128x128xf32> to vector<128x128xbf16>
      %c0_15 = arith.constant 0 : index
      %c0_16 = arith.constant 0 : index
      %c0_17 = arith.constant 0 : index
      %18 = vector.load %arg6[%c0_15, %c0_16, %c0_17] : memref<1x128x128xbf16, #tpu.memory_space<vmem>>, vector<1x128x128xbf16>
      %19 = vector.shape_cast %18 : vector<1x128x128xbf16> to vector<128x128xbf16>
      %20 = vector.shape_cast %17 : vector<128x128xbf16> to vector<1x128x128xbf16>
      tpu.vector_store %arg6[%c0_15, %c0_16, %c0_17], %20 {strides = array<i32>} : memref<1x128x128xbf16, #tpu.memory_space<vmem>>, vector<1x128x128xbf16>,
    } else {
    }
    return
  }
  func.func @transform_0(%arg0: i32, %arg1: i32, %arg2: i32, %arg3: i32) -> (i32, i32, i32) {
    %c0_i32 = arith.constant 0 : i32
    return %arg0, %arg1, %arg3 : i32, i32, i32
  }
  func.func @transform_1(%arg0: i32, %arg1: i32, %arg2: i32, %arg3: i32) -> (i32, i32, i32) {
    %c0_i32 = arith.constant 0 : i32
    return %arg0, %arg3, %arg2 : i32, i32, i32
  }
  func.func @transform_2(%arg0: i32, %arg1: i32, %arg2: i32, %arg3: i32) -> (i32, i32, i32) {
    %c0_i32 = arith.constant 0 : i32
    return %arg0, %arg1, %arg2 : i32, i32, i32
  }
}

module attributes {stable_mosaic.version = 11 : i64} {
  func.func @_mm_stats_kernel(%arg0: i32, %arg1: i32, %arg2: i32, %arg3: i32, %arg4: memref<1x128x512xbf16, #tpu.memory_space<vmem>>, %arg5: memref<1x512x128xbf16, #tpu.memory_space<vmem>>, %arg6: memref<1x128x128xbf16, #tpu.memory_space<vmem>>, %arg7: memref<1x8x128xf32, #tpu.memory_space<vmem>>, %arg8: memref<1x8x128xf32, #tpu.memory_space<vmem>>, %arg9: memref<128x128xf32, #tpu.memory_space<vmem>>, %arg10: memref<1x128xf32, #tpu.memory_space<vmem>>, %arg11: memref<1x128xf32, #tpu.memory_space<vmem>>) attributes {dimension_semantics = [#tpu.dimension_semantics<parallel>, #tpu.dimension_semantics<parallel>, #tpu.dimension_semantics<arbitrary>, #tpu.dimension_semantics<arbitrary>], iteration_bounds = array<i64: 4, 1, 1, 1>, scalar_prefetch = 0 : i64, scratch_operands = 3 : i64, tpu.core_type = #tpu.core_type<tc>, window_params = [{transform_indices = @transform_0, window_bounds = array<i64: 1, 128, 512>}, {transform_indices = @transform_1, window_bounds = array<i64: 1, 512, 128>}, {transform_indices = @transform_2, window_bounds = array<i64: 1, 128, 128>}, {transform_indices = @transform_3, window_bounds = array<i64: 1, 8, 128>}, {transform_indices = @transform_4, window_bounds = array<i64: 1, 8, 128>}]} {
    %c0_i32 = arith.constant 0 : i32
    %0 = arith.cmpi eq, %arg2, %c0_i32 : i32
    %c0_i32_0 = arith.constant 0 : i32
    %1 = arith.cmpi eq, %arg3, %c0_i32_0 : i32
    %2 = arith.andi %0, %1 : i1
    %3 = arith.extui %2 : i1 to i32
    %c0_i32_1 = arith.constant 0 : i32
    %4 = arith.cmpi ne, %3, %c0_i32_1 : i32
    scf.if %4 {
      %cst_18 = arith.constant 0.000000e+00 : f32
      %24 = vector.broadcast %cst_18 : f32 to vector<1x128xf32>
      %c0_19 = arith.constant 0 : index
      %c0_20 = arith.constant 0 : index
      %25 = vector.load %arg10[%c0_19, %c0_20] : memref<1x128xf32, #tpu.memory_space<vmem>>, vector<1x128xf32>
      tpu.vector_store %arg10[%c0_19, %c0_20], %24 {strides = array<i32>} : memref<1x128xf32, #tpu.memory_space<vmem>>, vector<1x128xf32>,
      %cst_21 = arith.constant 0.000000e+00 : f32
      %26 = vector.broadcast %cst_21 : f32 to vector<1x128xf32>
      %c0_22 = arith.constant 0 : index
      %c0_23 = arith.constant 0 : index
      %27 = vector.load %arg11[%c0_22, %c0_23] : memref<1x128xf32, #tpu.memory_space<vmem>>, vector<1x128xf32>
      tpu.vector_store %arg11[%c0_22, %c0_23], %26 {strides = array<i32>} : memref<1x128xf32, #tpu.memory_space<vmem>>, vector<1x128xf32>,
    } else {
    }
    %c0_i32_2 = arith.constant 0 : i32
    %5 = arith.cmpi eq, %arg3, %c0_i32_2 : i32
    %6 = arith.extui %5 : i1 to i32
    %c0_i32_3 = arith.constant 0 : i32
    %7 = arith.cmpi ne, %6, %c0_i32_3 : i32
    scf.if %7 {
      %cst_18 = arith.constant 0.000000e+00 : f32
      %24 = vector.broadcast %cst_18 : f32 to vector<128x128xf32>
      %c0_19 = arith.constant 0 : index
      %c0_20 = arith.constant 0 : index
      %25 = vector.load %arg9[%c0_19, %c0_20] : memref<128x128xf32, #tpu.memory_space<vmem>>, vector<128x128xf32>
      tpu.vector_store %arg9[%c0_19, %c0_20], %24 {strides = array<i32>} : memref<128x128xf32, #tpu.memory_space<vmem>>, vector<128x128xf32>,
    } else {
    }
    %c0 = arith.constant 0 : index
    %c0_4 = arith.constant 0 : index
    %8 = vector.load %arg9[%c0, %c0_4] : memref<128x128xf32, #tpu.memory_space<vmem>>, vector<128x128xf32>
    %c0_5 = arith.constant 0 : index
    %c0_6 = arith.constant 0 : index
    %c0_7 = arith.constant 0 : index
    %9 = vector.load %arg4[%c0_5, %c0_6, %c0_7] : memref<1x128x512xbf16, #tpu.memory_space<vmem>>, vector<1x128x512xbf16>
    %10 = vector.shape_cast %9 : vector<1x128x512xbf16> to vector<128x512xbf16>
    %c0_8 = arith.constant 0 : index
    %c0_9 = arith.constant 0 : index
    %c0_10 = arith.constant 0 : index
    %11 = vector.load %arg5[%c0_8, %c0_9, %c0_10] : memref<1x512x128xbf16, #tpu.memory_space<vmem>>, vector<1x512x128xbf16>
    %12 = vector.shape_cast %11 : vector<1x512x128xbf16> to vector<512x128xbf16>
    %cst = arith.constant dense<0.000000e+00> : vector<128x128xf32>
    %13 = tpu.matmul %10, %12, %cst {dimension_numbers = #tpu.dot_dimension_numbers<[1], [0], [0], [1], [0, 0, 1, 1], [], []>} : vector<128x512xbf16>, vector<512x128xbf16>, vector<128x128xf32> -> vector<128x128xf32>
    %14 = arith.addf %8, %13 : vector<128x128xf32>
    %c0_11 = arith.constant 0 : index
    %c0_12 = arith.constant 0 : index
    %15 = vector.load %arg9[%c0_11, %c0_12] : memref<128x128xf32, #tpu.memory_space<vmem>>, vector<128x128xf32>
    tpu.vector_store %arg9[%c0_11, %c0_12], %14 {strides = array<i32>} : memref<128x128xf32, #tpu.memory_space<vmem>>, vector<128x128xf32>,
    %c0_i32_13 = arith.constant 0 : i32
    %16 = arith.cmpi eq, %arg3, %c0_i32_13 : i32
    %17 = arith.extui %16 : i1 to i32
    %c0_i32_14 = arith.constant 0 : i32
    %18 = arith.cmpi ne, %17, %c0_i32_14 : i32
    scf.if %18 {
      %c0_18 = arith.constant 0 : index
      %c0_19 = arith.constant 0 : index
      %24 = vector.load %arg9[%c0_18, %c0_19] : memref<128x128xf32, #tpu.memory_space<vmem>>, vector<128x128xf32>
      %25 = arith.truncf %24 : vector<128x128xf32> to vector<128x128xbf16>
      %c0_20 = arith.constant 0 : index
      %c0_21 = arith.constant 0 : index
      %c0_22 = arith.constant 0 : index
      %26 = vector.load %arg6[%c0_20, %c0_21, %c0_22] : memref<1x128x128xbf16, #tpu.memory_space<vmem>>, vector<1x128x128xbf16>
      %27 = vector.shape_cast %26 : vector<1x128x128xbf16> to vector<128x128xbf16>
      %28 = vector.shape_cast %25 : vector<128x128xbf16> to vector<1x128x128xbf16>
      tpu.vector_store %arg6[%c0_20, %c0_21, %c0_22], %28 {strides = array<i32>} : memref<1x128x128xbf16, #tpu.memory_space<vmem>>, vector<1x128x128xbf16>,
      %c0_23 = arith.constant 0 : index
      %c0_24 = arith.constant 0 : index
      %29 = vector.load %arg10[%c0_23, %c0_24] : memref<1x128xf32, #tpu.memory_space<vmem>>, vector<1x128xf32>
      %cst_25 = arith.constant dense<0.000000e+00> : vector<128xf32>
      %30 = vector.multi_reduction <add>, %24, %cst_25 [0] : vector<128x128xf32> to vector<128xf32>
      %31 = vector.shape_cast %30 : vector<128xf32> to vector<1x128xf32>
      %32 = arith.addf %29, %31 : vector<1x128xf32>
      %c0_26 = arith.constant 0 : index
      %c0_27 = arith.constant 0 : index
      %33 = vector.load %arg10[%c0_26, %c0_27] : memref<1x128xf32, #tpu.memory_space<vmem>>, vector<1x128xf32>
      tpu.vector_store %arg10[%c0_26, %c0_27], %32 {strides = array<i32>} : memref<1x128xf32, #tpu.memory_space<vmem>>, vector<1x128xf32>,
      %c0_28 = arith.constant 0 : index
      %c0_29 = arith.constant 0 : index
      %34 = vector.load %arg11[%c0_28, %c0_29] : memref<1x128xf32, #tpu.memory_space<vmem>>, vector<1x128xf32>
      %35 = arith.mulf %24, %24 : vector<128x128xf32>
      %cst_30 = arith.constant dense<0.000000e+00> : vector<128xf32>
      %36 = vector.multi_reduction <add>, %35, %cst_30 [0] : vector<128x128xf32> to vector<128xf32>
      %37 = vector.shape_cast %36 : vector<128xf32> to vector<1x128xf32>
      %38 = arith.addf %34, %37 : vector<1x128xf32>
      %c0_31 = arith.constant 0 : index
      %c0_32 = arith.constant 0 : index
      %39 = vector.load %arg11[%c0_31, %c0_32] : memref<1x128xf32, #tpu.memory_space<vmem>>, vector<1x128xf32>
      tpu.vector_store %arg11[%c0_31, %c0_32], %38 {strides = array<i32>} : memref<1x128xf32, #tpu.memory_space<vmem>>, vector<1x128xf32>,
    } else {
    }
    %c0_i32_15 = arith.constant 0 : i32
    %19 = arith.cmpi eq, %arg2, %c0_i32_15 : i32
    %c0_i32_16 = arith.constant 0 : i32
    %20 = arith.cmpi eq, %arg3, %c0_i32_16 : i32
    %21 = arith.andi %19, %20 : i1
    %22 = arith.extui %21 : i1 to i32
    %c0_i32_17 = arith.constant 0 : i32
    %23 = arith.cmpi ne, %22, %c0_i32_17 : i32
    scf.if %23 {
      %c0_18 = arith.constant 0 : index
      %c0_19 = arith.constant 0 : index
      %24 = vector.load %arg10[%c0_18, %c0_19] : memref<1x128xf32, #tpu.memory_space<vmem>>, vector<1x128xf32>
      %25 = vector.shape_cast %24 : vector<1x128xf32> to vector<1x128xf32>
      %26 = vector.broadcast %25 : vector<1x128xf32> to vector<8x128xf32>
      %c0_20 = arith.constant 0 : index
      %c0_21 = arith.constant 0 : index
      %c0_22 = arith.constant 0 : index
      %27 = vector.load %arg7[%c0_20, %c0_21, %c0_22] : memref<1x8x128xf32, #tpu.memory_space<vmem>>, vector<1x8x128xf32>
      %28 = vector.shape_cast %27 : vector<1x8x128xf32> to vector<8x128xf32>
      %29 = vector.shape_cast %26 : vector<8x128xf32> to vector<1x8x128xf32>
      tpu.vector_store %arg7[%c0_20, %c0_21, %c0_22], %29 {strides = array<i32>} : memref<1x8x128xf32, #tpu.memory_space<vmem>>, vector<1x8x128xf32>,
      %c0_23 = arith.constant 0 : index
      %c0_24 = arith.constant 0 : index
      %30 = vector.load %arg11[%c0_23, %c0_24] : memref<1x128xf32, #tpu.memory_space<vmem>>, vector<1x128xf32>
      %31 = vector.shape_cast %30 : vector<1x128xf32> to vector<1x128xf32>
      %32 = vector.broadcast %31 : vector<1x128xf32> to vector<8x128xf32>
      %c0_25 = arith.constant 0 : index
      %c0_26 = arith.constant 0 : index
      %c0_27 = arith.constant 0 : index
      %33 = vector.load %arg8[%c0_25, %c0_26, %c0_27] : memref<1x8x128xf32, #tpu.memory_space<vmem>>, vector<1x8x128xf32>
      %34 = vector.shape_cast %33 : vector<1x8x128xf32> to vector<8x128xf32>
      %35 = vector.shape_cast %32 : vector<8x128xf32> to vector<1x8x128xf32>
      tpu.vector_store %arg8[%c0_25, %c0_26, %c0_27], %35 {strides = array<i32>} : memref<1x8x128xf32, #tpu.memory_space<vmem>>, vector<1x8x128xf32>,
    } else {
    }
    return
  }
  func.func @transform_0(%arg0: i32, %arg1: i32, %arg2: i32, %arg3: i32) -> (i32, i32, i32) {
    %c0_i32 = arith.constant 0 : i32
    return %arg0, %arg2, %arg3 : i32, i32, i32
  }
  func.func @transform_1(%arg0: i32, %arg1: i32, %arg2: i32, %arg3: i32) -> (i32, i32, i32) {
    %c0_i32 = arith.constant 0 : i32
    return %arg0, %arg3, %arg1 : i32, i32, i32
  }
  func.func @transform_2(%arg0: i32, %arg1: i32, %arg2: i32, %arg3: i32) -> (i32, i32, i32) {
    %c0_i32 = arith.constant 0 : i32
    return %arg0, %arg2, %arg1 : i32, i32, i32
  }
  func.func @transform_3(%arg0: i32, %arg1: i32, %arg2: i32, %arg3: i32) -> (i32, i32, i32) {
    %c0_i32 = arith.constant 0 : i32
    %c0_i32_0 = arith.constant 0 : i32
    return %arg0, %c0_i32, %arg1 : i32, i32, i32
  }
  func.func @transform_4(%arg0: i32, %arg1: i32, %arg2: i32, %arg3: i32) -> (i32, i32, i32) {
    %c0_i32 = arith.constant 0 : i32
    %c0_i32_0 = arith.constant 0 : i32
    return %arg0, %c0_i32, %arg1 : i32, i32, i32
  }
}

module attributes {stable_mosaic.version = 11 : i64} {
  func.func @_scale_shift_kernel(%arg0: i32, %arg1: i32, %arg2: memref<1x128x128xbf16, #tpu.memory_space<vmem>>, %arg3: memref<1x128xf32, #tpu.memory_space<vmem>>, %arg4: memref<1x128xf32, #tpu.memory_space<vmem>>, %arg5: memref<1x128x128xf32, #tpu.memory_space<vmem>>) attributes {dimension_semantics = [#tpu.dimension_semantics<parallel>, #tpu.dimension_semantics<parallel>], iteration_bounds = array<i64: 4, 1>, scalar_prefetch = 0 : i64, scratch_operands = 0 : i64, tpu.core_type = #tpu.core_type<tc>, window_params = [{transform_indices = @transform_0, window_bounds = array<i64: 1, 128, 128>}, {pipeline_mode = #tpu.pipeline_mode<synchronous>, transform_indices = @transform_1, window_bounds = array<i64: 1, 128>}, {pipeline_mode = #tpu.pipeline_mode<synchronous>, transform_indices = @transform_2, window_bounds = array<i64: 1, 128>}, {transform_indices = @transform_3, window_bounds = array<i64: 1, 128, 128>}]} {
    %c0 = arith.constant 0 : index
    %c0_0 = arith.constant 0 : index
    %c0_1 = arith.constant 0 : index
    %0 = vector.load %arg2[%c0, %c0_0, %c0_1] : memref<1x128x128xbf16, #tpu.memory_space<vmem>>, vector<1x128x128xbf16>
    %1 = vector.shape_cast %0 : vector<1x128x128xbf16> to vector<128x128xbf16>
    %2 = arith.extf %1 : vector<128x128xbf16> to vector<128x128xf32>
    %c0_2 = arith.constant 0 : index
    %c0_3 = arith.constant 0 : index
    %3 = vector.load %arg3[%c0_2, %c0_3] : memref<1x128xf32, #tpu.memory_space<vmem>>, vector<1x128xf32>
    %4 = vector.broadcast %3 : vector<1x128xf32> to vector<128x128xf32>
    %5 = arith.mulf %2, %4 : vector<128x128xf32>
    %c0_4 = arith.constant 0 : index
    %c0_5 = arith.constant 0 : index
    %6 = vector.load %arg4[%c0_4, %c0_5] : memref<1x128xf32, #tpu.memory_space<vmem>>, vector<1x128xf32>
    %7 = vector.broadcast %6 : vector<1x128xf32> to vector<128x128xf32>
    %8 = arith.addf %5, %7 : vector<128x128xf32>
    %c0_6 = arith.constant 0 : index
    %c0_7 = arith.constant 0 : index
    %c0_8 = arith.constant 0 : index
    %9 = vector.load %arg5[%c0_6, %c0_7, %c0_8] : memref<1x128x128xf32, #tpu.memory_space<vmem>>, vector<1x128x128xf32>
    %10 = vector.shape_cast %9 : vector<1x128x128xf32> to vector<128x128xf32>
    %11 = vector.shape_cast %8 : vector<128x128xf32> to vector<1x128x128xf32>
    tpu.vector_store %arg5[%c0_6, %c0_7, %c0_8], %11 {strides = array<i32>} : memref<1x128x128xf32, #tpu.memory_space<vmem>>, vector<1x128x128xf32>,
    return
  }
  func.func @transform_0(%arg0: i32, %arg1: i32) -> (i32, i32, i32) {
    %c0_i32 = arith.constant 0 : i32
    %c0_i32_0 = arith.constant 0 : i32
    return %arg0, %arg1, %c0_i32 : i32, i32, i32
  }
  func.func @transform_1(%arg0: i32, %arg1: i32) -> (i32, i32) {
    %c0_i32 = arith.constant 0 : i32
    %c0_i32_0 = arith.constant 0 : i32
    %c0_i32_1 = arith.constant 0 : i32
    return %c0_i32, %c0_i32_0 : i32, i32
  }
  func.func @transform_2(%arg0: i32, %arg1: i32) -> (i32, i32) {
    %c0_i32 = arith.constant 0 : i32
    %c0_i32_0 = arith.constant 0 : i32
    %c0_i32_1 = arith.constant 0 : i32
    return %c0_i32, %c0_i32_0 : i32, i32
  }
  func.func @transform_3(%arg0: i32, %arg1: i32) -> (i32, i32, i32) {
    %c0_i32 = arith.constant 0 : i32
    %c0_i32_0 = arith.constant 0 : i32
    return %arg0, %arg1, %c0_i32 : i32, i32, i32
  }
}

</mosaic_0001>

<bundles_post_ra>
// kernel: unet_block_innermost.3
= control target key start
LH: loop header
LB: loop body
LE: loop exit
PB: predicated region body
PF: predicated region fallthrough
CT: control target
= control target key end

     0   :  { %vm136_vm0 = vcmask 523264   ;;  %s647_s1 = inlined_call_operand.vmem [shape: bf16[1,64,128], index: 1, kind: input, shape index: {}]   ;;  %s648_s0 = inlined_call_operand.vmem [shape: bf16[1,128,64], index: 0, kind: input, shape index: {}]   ;;  %s649_s2 = inlined_call_operand.vmem [shape: bf16[1,128,128], index: 2, kind: output, shape index: {}]  }
   0x1   :  { %v552_v0 = vld [vmem:[%s647_s1] sm:$0xff]   ;;  %v553_v1 = vld [vmem:[%s647_s1 + $0x8] sm:$0xff]   ;;  %v554_v2 = vld [vmem:[%s647_s1 + $0x10] sm:$0xff]  }
   0x2   :  { %520 = vmatprep.subr.bf16.mxu0 %v552_v0  ;;  %544 = vmatprep.subr.bf16.mxu1 %v552_v0  ;;  %v556_v3 = vld [vmem:[%s648_s0] sm:$0xff]   ;;  %v555_v5 = vld [vmem:[%s647_s1 + $0x18] sm:$0xff]   ;;  %v558_v6 = vld [vmem:[%s648_s0 + $0x8] sm:$0xff]  }
   0x3   :  { %521 = vmatpush3.bf16.msra.mxu0 %v552_v0  ;;  %548 = vmatpush3.bf16.msra.mxu1 %v552_v0  ;;  %v557_v4 = vld [vmem:[%s648_s0 + $0x20] sm:$0xff]   ;;  %v559_v7 = vld [vmem:[%s648_s0 + $0x28] sm:$0xff]   ;;  %v560_v8 = vld [vmem:[%s648_s0 + $0x10] sm:$0xff]  }
   0x4   :  { %522 = vmatprep.subr.bf16.mxu0 %v553_v1  ;;  %545 = vmatprep.subr.bf16.mxu1 %v553_v1  ;;  %v561_v9 = vld [vmem:[%s648_s0 + $0x30] sm:$0xff]   ;;  %v562_v10 = vld [vmem:[%s648_s0 + $0x18] sm:$0xff]  }
   0x5   :  { %528 = vmatprep.mubr.msk.bf16.mxu0 %vm136_vm0, %v556_v3  ;;  %536 = vmatprep.mubr.msk.bf16.mxu1 %vm136_vm0, %v557_v4  ;;  %v563_v11 = vld [vmem:[%s648_s0 + $0x38] sm:$0xff]  }
   0x7   :  { %523 = vmatpush3.bf16.msra.mxu0 %v553_v1  ;;  %549 = vmatpush3.bf16.msra.mxu1 %v553_v1 }
   0x8   :  { %524 = vmatprep.subr.bf16.mxu0 %v554_v2  ;;  %546 = vmatprep.subr.bf16.mxu1 %v554_v2 }
   0xb   :  { %525 = vmatpush3.bf16.msra.mxu0 %v554_v2  ;;  %550 = vmatpush3.bf16.msra.mxu1 %v554_v2 }
   0xc   :  { %526 = vmatprep.subr.bf16.mxu0 %v555_v5  ;;  %547 = vmatprep.subr.bf16.mxu1 %v555_v5 }
   0xf   :  { %527 = vmatpush3.bf16.msra.mxu0 %v555_v5  ;;  %551 = vmatpush3.bf16.msra.mxu1 %v555_v5 }
  0x12   :  { %529 = vmatmul.mubr.msk.bf16.vlgmr.msra.gmra.mrb[0].mxu0 %vm136_vm0, %v558_v6  ;;  %537 = vmatmul.mubr.msk.bf16.vlgmr.msra.gmra.mrb[0].mxu1 %vm136_vm0, %v559_v7 }
  0x13   :  { %532 = vmatprep.mubr.msk.bf16.mxu0 %vm136_vm0, %v560_v8  ;;  %540 = vmatprep.mubr.msk.bf16.mxu1 %vm136_vm0, %v561_v9 }
  0x1a   :  { %533 = vmatmul.mubr.msk.bf16.gmra.mrb[4].mxu0 %vm136_vm0, %v562_v10  ;;  %541 = vmatmul.mubr.msk.bf16.gmra.mrb[4].mxu1 %vm136_vm0, %v563_v11 }
  0xe5   :  { %v530_v12 = vpop.f32.mrb[0].mxu0  ;;  %v538_v13 = vpop.f32.mrb[0].mxu1 }
  0xe6   :  { %v195_v14 = vpop.f32.mrb[1].mxu0  ;;  %v227_v15 = vpop.f32.mrb[1].mxu1  ;;  %v311_v18 = vmax.f32 %v530_v12, 0.0  ;;  %v319_v19 = vmax.f32 %v538_v13, 0.0 }
  0xe7   :  { %v531_v16 = vpop.f32.mrb[2].mxu0  ;;  %v539_v17 = vpop.f32.mrb[2].mxu1  ;;  %v309_v24 = vmax.f32 %v195_v14, 0.0  ;;  %v317_v25 = vmax.f32 %v227_v15, 0.0 }
  0xe8   :  { %v312_v20 = vmax.f32 %v531_v16, 0.0  ;;  %v320_v21 = vmax.f32 %v539_v17, 0.0  ;;  %v198_v22 = vpop.f32.mrb[3].mxu0  ;;  %v230_v23 = vpop.f32.mrb[3].mxu1 }
  0xe9   :  { %v310_v26 = vmax.f32 %v198_v22, 0.0  ;;  %v318_v27 = vmax.f32 %v230_v23, 0.0 }
  0xea   :  { %v469_v28 = vpack.c.bf16 %v312_v20, %v311_v18  ;;  %v489_v29 = vpack.c.bf16 %v320_v21, %v319_v19 }
  0xeb   :  { %v464_v30 = vpack.c.bf16 %v310_v26, %v309_v24  ;;  %v484_v31 = vpack.c.bf16 %v318_v27, %v317_v25 }
  0xec   :  { %501 = vst [vmem:[%s649_s2 + $0x8] sm:$0xff] %v469_v28   ;;  %505 = vst [vmem:[%s649_s2 + $0x28] sm:$0xff] %v489_v29  }
  0xed   :  { %465 = vst [vmem:[%s649_s2] sm:$0xff] %v464_v30   ;;  %504 = vst [vmem:[%s649_s2 + $0x20] sm:$0xff] %v484_v31   ;;  %v534_v32 = vpop.f32.mrb[4].mxu0  ;;  %v542_v33 = vpop.f32.mrb[4].mxu1 }
  0xee   :  { %v211_v34 = vpop.f32.mrb[5].mxu0  ;;  %v243_v35 = vpop.f32.mrb[5].mxu1  ;;  %v315_v38 = vmax.f32 %v534_v32, 0.0  ;;  %v323_v39 = vmax.f32 %v542_v33, 0.0 }
  0xef   :  { %v535_v36 = vpop.f32.mrb[6].mxu0  ;;  %v543_v37 = vpop.f32.mrb[6].mxu1  ;;  %v313_v44 = vmax.f32 %v211_v34, 0.0  ;;  %v321_v45 = vmax.f32 %v243_v35, 0.0 }
  0xf0   :  { %v316_v40 = vmax.f32 %v535_v36, 0.0  ;;  %v324_v41 = vmax.f32 %v543_v37, 0.0  ;;  %v214_v42 = vpop.f32.mrb[7].mxu0  ;;  %v246_v43 = vpop.f32.mrb[7].mxu1 }
  0xf1   :  { %v314_v46 = vmax.f32 %v214_v42, 0.0  ;;  %v322_v47 = vmax.f32 %v246_v43, 0.0 }
  0xf2   :  { %v479_v48 = vpack.c.bf16 %v316_v40, %v315_v38  ;;  %v499_v49 = vpack.c.bf16 %v324_v41, %v323_v39 }
  0xf3   :  { %v474_v50 = vpack.c.bf16 %v314_v46, %v313_v44  ;;  %v494_v51 = vpack.c.bf16 %v322_v47, %v321_v45 }
  0xf4   :  { %503 = vst [vmem:[%s649_s2 + $0x18] sm:$0xff] %v479_v48   ;;  %507 = vst [vmem:[%s649_s2 + $0x38] sm:$0xff] %v499_v49  }
  0xf5   :  { %502 = vst [vmem:[%s649_s2 + $0x10] sm:$0xff] %v474_v50   ;;  %506 = vst [vmem:[%s649_s2 + $0x30] sm:$0xff] %v494_v51  }

// kernel: unet_block_innermost.4
= control target key start
LH: loop header
LB: loop body
LE: loop exit
PB: predicated region body
PF: predicated region fallthrough
CT: control target
= control target key end

     0   :  { %s1919_s15 = smov 0   ;;  %s1921_s16 = smov 0   ;;  %s2048_s0 = inlined_call_operand.vmem [shape: bf16[4,128,512], index: 0, kind: input, shape index: {}]   ;;  %s2049_s1 = inlined_call_operand.vmem [shape: bf16[4,512,128], index: 1, kind: input, shape index: {}]   ;;  %s2050_s2 = inlined_call_operand.vmem [shape: bf16[4,128,128], index: 2, kind: output, shape index: {0}]   ;;  %s2051_s3 = inlined_call_operand.vmem [shape: f32[4,8,128], index: 3, kind: output, shape index: {1}]   ;;  %s2052_s4 = inlined_call_operand.vmem [shape: f32[4,8,128], index: 4, kind: output, shape index: {2}]  }
   0x1   :  { %s1923_s17 = smov 0  }
   0x2 LB: > { %s41_s18 = sadd.s32 1, %s1887_s16  ;;  %p1477_p0 = scmp.ge.s32.totalorder %s1891_s17, 1  ;;  %s1891_s17 = sphi %s1923_s17, %s15_s17   ;;  %s1887_s16 = sphi %s1921_s16, %s2054_s16   ;;  %s1883_s15 = sphi %s1919_s15, %s2053_s15  }
   0x3   : > { %p43_p1 = scmp.ge.s32.totalorder %s41_s18, 4  ;;  %p238_p2 = scmp.lt.s32.totalorder %s1891_s17, 5 }
   0x5   : > { %s2056_s18 = smov (%p43_p1, %s41_s18), 0  ;;  %p239_p3 = pnand %p1477_p0, %p238_p2 }
   0x6   : > { %p308_p4 = scmp.lt.s32.totalorder (!%p239_p3), %s1883_s15, 3 }
   0x7   : > { %242 = sbr.rel (%p239_p3) target bundleno = 354 (0x162), region = 28 }
   0xe   : > { %s2058_s15 = smov (!%p308_p4, %s1883_s15), 3 }
   0xf   : > { %s1570_s19 = sshll.u32 %s2058_s15, 8  ;;  %s1572_s26 = sshll.u32 %s2058_s15, 6 }
  0x10   : > { %s1945_s22 = scalar_lea.vmem %s2049_s1, %s1570_s19  ;;  %s1982_s25 = scalar_lea.vmem %s2048_s0, %s1570_s19 }
  0x11   : > { %v1789_v0 = vld [vmem:[%s1945_s22 + $0x40] sm:$0xff]   ;;  %v1793_v4 = vld [vmem:[%s1945_s22 + $0x48] sm:$0xff]   ;;  %v1797_v8 = vld [vmem:[%s1945_s22 + $0x50] sm:$0xff]   ;;  %s2022_s29 = scalar_lea.vmem %s2050_s2, %s1572_s26  ;;  %s1484_s30 = sshll.u32 %s2058_s15, 3 }
  0x12   : > { %v1790_v1 = vld [vmem:[%s1945_s22 + $0xc0] sm:$0xff]   ;;  %1636 = vmatprep.subr.bf16.mxu0 %v1789_v0  ;;  %v1794_v5 = vld [vmem:[%s1945_s22 + $0xc8] sm:$0xff]   ;;  %v1798_v9 = vld [vmem:[%s1945_s22 + $0xd0] sm:$0xff]   ;;  %v1893_v0 = vmov 0.0   ;;  %s354_s7 = scalar_lea.vmem %s2051_s3, %s1484_s30  ;;  %s361_s10 = scalar_lea.vmem %s2052_s4, %s1484_s30 }
  0x13   : > { %v1791_v2 = vld [vmem:[%s1945_s22] sm:$0xff]   ;;  %1700 = vmatprep.subr.bf16.mxu1 %v1790_v1  ;;  %v1795_v6 = vld [vmem:[%s1945_s22 + $0x8] sm:$0xff]   ;;  %v1799_v10 = vld [vmem:[%s1945_s22 + $0x10] sm:$0xff]   ;;  %369 = vst [vmem:[#allocation3] sm:$0x1] %v1893_v0 }
  0x14   : > { %v1792_v3 = vld [vmem:[%s1945_s22 + $0x80] sm:$0xff]   ;;  %1637 = vmatpush3.bf16.msra.mxu0 %v1791_v2  ;;  %v1796_v7 = vld [vmem:[%s1945_s22 + $0x88] sm:$0xff]   ;;  %v1800_v11 = vld [vmem:[%s1945_s22 + $0x90] sm:$0xff]   ;;  %370 = vst [vmem:[#allocation4] sm:$0x1] %v1893_v0 }
  0x15   : > { %1701 = vmatpush3.bf16.msra.mxu1 %v1792_v3  ;;  %1638 = vmatprep.subr.bf16.mxu0 %v1793_v4  ;;  %v1801_v12 = vld [vmem:[%s1945_s22 + $0x58] sm:$0xff]   ;;  %v1805_v16 = vld [vmem:[%s1945_s22 + $0x60] sm:$0xff]   ;;  %v1809_v20 = vld [vmem:[%s1945_s22 + $0x68] sm:$0xff]  }
  0x16   : > { %1702 = vmatprep.subr.bf16.mxu1 %v1794_v5  ;;  %v1802_v13 = vld [vmem:[%s1945_s22 + $0xd8] sm:$0xff]   ;;  %v1806_v17 = vld [vmem:[%s1945_s22 + $0xe0] sm:$0xff]   ;;  %v1810_v21 = vld [vmem:[%s1945_s22 + $0xe8] sm:$0xff]  }
  0x17   : > { %v1803_v14 = vld [vmem:[%s1945_s22 + $0x18] sm:$0xff]   ;;  %v1807_v18 = vld [vmem:[%s1945_s22 + $0x20] sm:$0xff]   ;;  %v1811_v22 = vld [vmem:[%s1945_s22 + $0x28] sm:$0xff]  }
  0x18   : > { %1639 = vmatpush3.bf16.msra.mxu0 %v1795_v6  ;;  %v1804_v15 = vld [vmem:[%s1945_s22 + $0x98] sm:$0xff]   ;;  %v1808_v19 = vld [vmem:[%s1945_s22 + $0xa0] sm:$0xff]   ;;  %v1812_v23 = vld [vmem:[%s1945_s22 + $0xa8] sm:$0xff]  }
  0x19   : > { %1703 = vmatpush3.bf16.msra.mxu1 %v1796_v7  ;;  %1640 = vmatprep.subr.bf16.mxu0 %v1797_v8  ;;  %v1813_v24 = vld [vmem:[%s1945_s22 + $0x70] sm:$0xff]   ;;  %v1817_v28 = vld [vmem:[%s1945_s22 + $0x78] sm:$0xff]  }
  0x1a   : > { %1704 = vmatprep.subr.bf16.mxu1 %v1798_v9  ;;  %v1814_v25 = vld [vmem:[%s1945_s22 + $0xf0] sm:$0xff]   ;;  %v1818_v29 = vld [vmem:[%s1945_s22 + $0xf8] sm:$0xff]  }
  0x1b   : > { %v1815_v26 = vld [vmem:[%s1945_s22 + $0x30] sm:$0xff]   ;;  %v1819_v30 = vld [vmem:[%s1945_s22 + $0x38] sm:$0xff]  }
  0x1c   : > { %1641 = vmatpush3.bf16.msra.mxu0 %v1799_v10  ;;  %v1816_v27 = vld [vmem:[%s1945_s22 + $0xb0] sm:$0xff]   ;;  %v1820_v31 = vld [vmem:[%s1945_s22 + $0xb8] sm:$0xff]  }
  0x1d   : > { %1705 = vmatpush3.bf16.msra.mxu1 %v1800_v11  ;;  %1642 = vmatprep.subr.bf16.mxu0 %v1801_v12  ;;  %v1821_v32 = vld [vmem:[%s1982_s25] ss:$16 sps:$4 sm:$0xff]   ;;  %v1823_v33 = vld [vmem:[%s1982_s25 + $0x4] ss:$16 sps:$4 sm:$0xff]   ;;  %v1824_v34 = vld [vmem:[%s1982_s25 + $0x8] ss:$16 sps:$4 sm:$0xff]  }
  0x1e   : > { %1706 = vmatprep.subr.bf16.mxu1 %v1802_v13  ;;  %v1826_v35 = vld [vmem:[%s1982_s25 + $0xc] ss:$16 sps:$4 sm:$0xff]   ;;  %886 = vmatprep.mubr.bf16.mxu0 %v1823_v33  ;;  %v1827_v36 = vld [vmem:[%s1982_s25 + $0x24] ss:$16 sps:$4 sm:$0xff]   ;;  %v1831_v38 = vld [vmem:[%s1982_s25 + $0x20] ss:$16 sps:$4 sm:$0xff]  }
  0x1f   : > { %983 = vmatprep.mubr.bf16.mxu1 %v1826_v35  ;;  %v1829_v37 = vld [vmem:[%s1982_s25 + $0x2c] ss:$16 sps:$4 sm:$0xff]   ;;  %v1832_v39 = vld [vmem:[%s1982_s25 + $0x28] ss:$16 sps:$4 sm:$0xff]   ;;  %v1833_v40 = vld [vmem:[%s1982_s25 + $0x44] ss:$16 sps:$4 sm:$0xff]  }
  0x20   : > { %1643 = vmatpush3.bf16.msra.mxu0 %v1803_v14  ;;  %v1835_v41 = vld [vmem:[%s1982_s25 + $0x4c] ss:$16 sps:$4 sm:$0xff]   ;;  %v1837_v42 = vld [vmem:[%s1982_s25 + $0x40] ss:$16 sps:$4 sm:$0xff]   ;;  %v1838_v43 = vld [vmem:[%s1982_s25 + $0x48] ss:$16 sps:$4 sm:$0xff]  }
  0x21   : > { %1707 = vmatpush3.bf16.msra.mxu1 %v1804_v15  ;;  %1644 = vmatprep.subr.bf16.mxu0 %v1805_v16  ;;  %v1839_v44 = vld [vmem:[%s1982_s25 + $0x64] ss:$16 sps:$4 sm:$0xff]   ;;  %v1841_v45 = vld [vmem:[%s1982_s25 + $0x6c] ss:$16 sps:$4 sm:$0xff]   ;;  %v1843_v46 = vld [vmem:[%s1982_s25 + $0x60] ss:$16 sps:$4 sm:$0xff]  }
  0x22   : > { %1708 = vmatprep.subr.bf16.mxu1 %v1806_v17  ;;  %v1844_v47 = vld [vmem:[%s1982_s25 + $0x68] ss:$16 sps:$4 sm:$0xff]   ;;  %v1845_v48 = vld [vmem:[%s1982_s25 + $0x84] ss:$16 sps:$4 sm:$0xff]   ;;  %v1847_v49 = vld [vmem:[%s1982_s25 + $0x8c] ss:$16 sps:$4 sm:$0xff]  }
  0x23   : > { %v1849_v50 = vld [vmem:[%s1982_s25 + $0x80] ss:$16 sps:$4 sm:$0xff]   ;;  %v1850_v51 = vld [vmem:[%s1982_s25 + $0x88] ss:$16 sps:$4 sm:$0xff]   ;;  %v1851_v52 = vld [vmem:[%s1982_s25 + $0xa4] ss:$16 sps:$4 sm:$0xff]  }
  0x24   : > { %1645 = vmatpush3.bf16.msra.mxu0 %v1807_v18  ;;  %v1853_v53 = vld [vmem:[%s1982_s25 + $0xac] ss:$16 sps:$4 sm:$0xff]   ;;  %v1855_v54 = vld [vmem:[%s1982_s25 + $0xa0] ss:$16 sps:$4 sm:$0xff]   ;;  %v1856_v55 = vld [vmem:[%s1982_s25 + $0xa8] ss:$16 sps:$4 sm:$0xff]  }
  0x25   : > { %1709 = vmatpush3.bf16.msra.mxu1 %v1808_v19  ;;  %1646 = vmatprep.subr.bf16.mxu0 %v1809_v20  ;;  %v1857_v56 = vld [vmem:[%s1982_s25 + $0xc4] ss:$16 sps:$4 sm:$0xff]   ;;  %v1859_v57 = vld [vmem:[%s1982_s25 + $0xcc] ss:$16 sps:$4 sm:$0xff]   ;;  %v1861_v58 = vld [vmem:[%s1982_s25 + $0xc0] ss:$16 sps:$4 sm:$0xff]  }
  0x26   : > { %1710 = vmatprep.subr.bf16.mxu1 %v1810_v21  ;;  %v1862_v59 = vld [vmem:[%s1982_s25 + $0xc8] ss:$16 sps:$4 sm:$0xff]   ;;  %v1863_v60 = vld [vmem:[%s1982_s25 + $0xe4] ss:$16 sps:$4 sm:$0xff]   ;;  %v1865_v61 = vld [vmem:[%s1982_s25 + $0xec] ss:$16 sps:$4 sm:$0xff]  }
  0x27   : > { %v1867_v62 = vld [vmem:[%s1982_s25 + $0xe0] ss:$16 sps:$4 sm:$0xff]   ;;  %v1868_v63 = vld [vmem:[%s1982_s25 + $0xe8] ss:$16 sps:$4 sm:$0xff]  }
  0x28   : > { %1647 = vmatpush3.bf16.msra.mxu0 %v1811_v22 }
  0x29   : > { %1711 = vmatpush3.bf16.msra.mxu1 %v1812_v23  ;;  %1648 = vmatprep.subr.bf16.mxu0 %v1813_v24 }
  0x2a   : > { %1712 = vmatprep.subr.bf16.mxu1 %v1814_v25 }
  0x2c   : > { %1649 = vmatpush3.bf16.msra.mxu0 %v1815_v26 }
  0x2d   : > { %1713 = vmatpush3.bf16.msra.mxu1 %v1816_v27  ;;  %1650 = vmatprep.subr.bf16.mxu0 %v1817_v28 }
  0x2e   : > { %1714 = vmatprep.subr.bf16.mxu1 %v1818_v29 }
  0x30   : > { %1651 = vmatpush3.bf16.msra.mxu0 %v1819_v30 }
  0x31   : > { %1715 = vmatpush3.bf16.msra.mxu1 %v1820_v31 }
  0x33   : > { %887 = vmatmul.mubr.bf16.vlgmr.msra.gmra.mrb[0].mxu0 %v1821_v32 }
  0x34   : > { %984 = vmatmul.mubr.bf16.vlgmr.msra.gmra.mrb[0].mxu1 %v1824_v34  ;;  %894 = vmatprep.mubr.bf16.mxu0 %v1827_v36 }
  0x35   : > { %991 = vmatprep.mubr.bf16.mxu1 %v1829_v37 }
  0x3b   : > { %895 = vmatmul.mubr.bf16.gmra.mrb[4].mxu0 %v1831_v38 }
  0x3c   : > { %992 = vmatmul.mubr.bf16.gmra.mrb[4].mxu1 %v1832_v39  ;;  %902 = vmatprep.mubr.bf16.mxu0 %v1833_v40 }
  0x3d   : > { %999 = vmatprep.mubr.bf16.mxu1 %v1835_v41 }
  0x43   : > { %903 = vmatmul.mubr.bf16.gmra.mrb[8].mxu0 %v1837_v42 }
  0x44   : > { %1000 = vmatmul.mubr.bf16.gmra.mrb[8].mxu1 %v1838_v43  ;;  %910 = vmatprep.mubr.bf16.mxu0 %v1839_v44 }
  0x45   : > { %1007 = vmatprep.mubr.bf16.mxu1 %v1841_v45 }
  0x4b   : > { %911 = vmatmul.mubr.bf16.gmra.mrb[12].mxu0 %v1843_v46 }
  0x4c   : > { %1008 = vmatmul.mubr.bf16.gmra.mrb[12].mxu1 %v1844_v47  ;;  %918 = vmatprep.mubr.bf16.mxu0 %v1845_v48 }
  0x4d   : > { %1015 = vmatprep.mubr.bf16.mxu1 %v1847_v49 }
  0x53   : > { %919 = vmatmul.mubr.bf16.gmra.mrb[16].mxu0 %v1849_v50 }
  0x54   : > { %1016 = vmatmul.mubr.bf16.gmra.mrb[16].mxu1 %v1850_v51  ;;  %926 = vmatprep.mubr.bf16.mxu0 %v1851_v52 }
  0x55   : > { %1023 = vmatprep.mubr.bf16.mxu1 %v1853_v53 }
  0x5b   : > { %927 = vmatmul.mubr.bf16.gmra.mrb[20].mxu0 %v1855_v54 }
  0x5c   : > { %1024 = vmatmul.mubr.bf16.gmra.mrb[20].mxu1 %v1856_v55  ;;  %934 = vmatprep.mubr.bf16.mxu0 %v1857_v56 }
  0x5d   : > { %1031 = vmatprep.mubr.bf16.mxu1 %v1859_v57 }
  0x63   : > { %935 = vmatmul.mubr.bf16.gmra.mrb[24].mxu0 %v1861_v58 }
  0x64   : > { %1032 = vmatmul.mubr.bf16.gmra.mrb[24].mxu1 %v1862_v59  ;;  %942 = vmatprep.mubr.bf16.mxu0 %v1863_v60 }
  0x65   : > { %1039 = vmatprep.mubr.bf16.mxu1 %v1865_v61 }
  0x6b   : > { %943 = vmatmul.mubr.bf16.gmra.mrb[28].mxu0 %v1867_v62 }
  0x6c   : > { %1040 = vmatmul.mubr.bf16.gmra.mrb[28].mxu1 %v1868_v63 }
 0x106   : > { %v1652_v1 = vpop.f32.mrb[0].mxu0 }
 0x107   : > { %v1716_v2 = vpop.f32.mrb[0].mxu1  ;;  %v1653_v3 = vpop.f32.mrb[1].mxu0 }
 0x108   : > { %v1654_v4 = vadd.f32 %v1653_v3, %v1652_v1  ;;  %v1717_v5 = vpop.f32.mrb[1].mxu1  ;;  %v1655_v6 = vpop.f32.mrb[2].mxu0 }
 0x109   : > { %v1718_v7 = vadd.f32 %v1717_v5, %v1716_v2  ;;  %v1719_v8 = vpop.f32.mrb[2].mxu1  ;;  %v1656_v9 = vpop.f32.mrb[3].mxu0 }
 0x10a   : > { %v1657_v10 = vadd.f32 %v1656_v9, %v1655_v6  ;;  %v1720_v11 = vpop.f32.mrb[3].mxu1 }
 0x10b   : > { %v986_v12 = vadd.f32 %v1718_v7, %v1654_v4  ;;  %v1721_v13 = vadd.f32 %v1720_v11, %v1719_v8 }
 0x10d   : > { %v989_v14 = vadd.f32 %v1721_v13, %v1657_v10  ;;  %v1204_v16 = vmul.f32 %v986_v12, %v986_v12 }
 0x10e   : > { %v1658_v15 = vpop.f32.mrb[4].mxu0 }
 0x10f   : > { %v1592_v17 = vpack.c.bf16 %v989_v14, %v986_v12  ;;  %v1180_v18 = vadd.f32 %v989_v14, %v986_v12  ;;  %v1205_v19 = vmul.f32 %v989_v14, %v989_v14  ;;  %v1722_v20 = vpop.f32.mrb[4].mxu1  ;;  %v1659_v21 = vpop.f32.mrb[5].mxu0 }
 0x110   : > { %v1660_v22 = vadd.f32 %v1659_v21, %v1658_v15  ;;  %v1723_v23 = vpop.f32.mrb[5].mxu1  ;;  %v1661_v24 = vpop.f32.mrb[6].mxu0 }
 0x111   : > { %1593 = vst [vmem:[%s2022_s29] sm:$0xff] %v1592_v17   ;;  %v1220_v25 = vadd.f32 %v1205_v19, %v1204_v16  ;;  %v1724_v26 = vadd.f32 %v1723_v23, %v1722_v20  ;;  %v1725_v27 = vpop.f32.mrb[6].mxu1  ;;  %v1662_v28 = vpop.f32.mrb[7].mxu0 }
 0x112   : > { %v1663_v29 = vadd.f32 %v1662_v28, %v1661_v24  ;;  %v1726_v30 = vpop.f32.mrb[7].mxu1 }
 0x113   : > { %v994_v31 = vadd.f32 %v1724_v26, %v1660_v22  ;;  %v1727_v32 = vadd.f32 %v1726_v30, %v1725_v27 }
 0x115   : > { %v1181_v33 = vadd.f32 %v1180_v18, %v994_v31  ;;  %v1206_v34 = vmul.f32 %v994_v31, %v994_v31  ;;  %v997_v35 = vadd.f32 %v1727_v32, %v1663_v29 }
 0x116   : > { %v1664_v36 = vpop.f32.mrb[8].mxu0 }
 0x117   : > { %v1221_v37 = vadd.f32 %v1220_v25, %v1206_v34  ;;  %v1597_v38 = vpack.c.bf16 %v997_v35, %v994_v31  ;;  %v1182_v39 = vadd.f32 %v1181_v33, %v997_v35  ;;  %v1207_v40 = vmul.f32 %v997_v35, %v997_v35  ;;  %v1728_v41 = vpop.f32.mrb[8].mxu1  ;;  %v1665_v42 = vpop.f32.mrb[9].mxu0 }
 0x118   : > { %v1666_v43 = vadd.f32 %v1665_v42, %v1664_v36  ;;  %v1729_v44 = vpop.f32.mrb[9].mxu1  ;;  %v1667_v45 = vpop.f32.mrb[10].mxu0 }
 0x119   : > { %1629 = vst [vmem:[%s2022_s29 + $0x8] sm:$0xff] %v1597_v38   ;;  %v1222_v46 = vadd.f32 %v1221_v37, %v1207_v40  ;;  %v1730_v47 = vadd.f32 %v1729_v44, %v1728_v41  ;;  %v1731_v48 = vpop.f32.mrb[10].mxu1  ;;  %v1668_v49 = vpop.f32.mrb[11].mxu0 }
 0x11a   : > { %v1669_v50 = vadd.f32 %v1668_v49, %v1667_v45  ;;  %v1732_v51 = vpop.f32.mrb[11].mxu1 }
 0x11b   : > { %v1002_v52 = vadd.f32 %v1730_v47, %v1666_v43  ;;  %v1733_v53 = vadd.f32 %v1732_v51, %v1731_v48 }
 0x11d   : > { %v1183_v54 = vadd.f32 %v1182_v39, %v1002_v52  ;;  %v1208_v55 = vmul.f32 %v1002_v52, %v1002_v52  ;;  %v1005_v56 = vadd.f32 %v1733_v53, %v1669_v50 }
 0x11e   : > { %v1670_v57 = vpop.f32.mrb[12].mxu0 }
 0x11f   : > { %v1223_v58 = vadd.f32 %v1222_v46, %v1208_v55  ;;  %v1602_v59 = vpack.c.bf16 %v1005_v56, %v1002_v52  ;;  %v1184_v60 = vadd.f32 %v1183_v54, %v1005_v56  ;;  %v1209_v61 = vmul.f32 %v1005_v56, %v1005_v56  ;;  %v1734_v62 = vpop.f32.mrb[12].mxu1  ;;  %v1671_v63 = vpop.f32.mrb[13].mxu0 }
 0x120   : > { %v1672_v0 = vadd.f32 %v1671_v63, %v1670_v57  ;;  %v1735_v1 = vpop.f32.mrb[13].mxu1  ;;  %v1673_v2 = vpop.f32.mrb[14].mxu0 }
 0x121   : > { %1630 = vst [vmem:[%s2022_s29 + $0x10] sm:$0xff] %v1602_v59   ;;  %v1224_v3 = vadd.f32 %v1223_v58, %v1209_v61  ;;  %v1736_v4 = vadd.f32 %v1735_v1, %v1734_v62  ;;  %v1737_v5 = vpop.f32.mrb[14].mxu1  ;;  %v1674_v6 = vpop.f32.mrb[15].mxu0 }
 0x122   : > { %v1675_v7 = vadd.f32 %v1674_v6, %v1673_v2  ;;  %v1738_v8 = vpop.f32.mrb[15].mxu1 }
 0x123   : > { %v1010_v9 = vadd.f32 %v1736_v4, %v1672_v0  ;;  %v1739_v10 = vadd.f32 %v1738_v8, %v1737_v5 }
 0x125   : > { %v1185_v11 = vadd.f32 %v1184_v60, %v1010_v9  ;;  %v1210_v12 = vmul.f32 %v1010_v9, %v1010_v9  ;;  %v1013_v13 = vadd.f32 %v1739_v10, %v1675_v7 }
 0x126   : > { %v1676_v14 = vpop.f32.mrb[16].mxu0 }
 0x127   : > { %v1225_v15 = vadd.f32 %v1224_v3, %v1210_v12  ;;  %v1607_v16 = vpack.c.bf16 %v1013_v13, %v1010_v9  ;;  %v1186_v17 = vadd.f32 %v1185_v11, %v1013_v13  ;;  %v1211_v18 = vmul.f32 %v1013_v13, %v1013_v13  ;;  %v1740_v19 = vpop.f32.mrb[16].mxu1  ;;  %v1677_v20 = vpop.f32.mrb[17].mxu0 }
 0x128   : > { %v1678_v21 = vadd.f32 %v1677_v20, %v1676_v14  ;;  %v1741_v22 = vpop.f32.mrb[17].mxu1  ;;  %v1679_v23 = vpop.f32.mrb[18].mxu0 }
 0x129   : > { %1631 = vst [vmem:[%s2022_s29 + $0x18] sm:$0xff] %v1607_v16   ;;  %v1226_v24 = vadd.f32 %v1225_v15, %v1211_v18  ;;  %v1742_v25 = vadd.f32 %v1741_v22, %v1740_v19  ;;  %v1743_v26 = vpop.f32.mrb[18].mxu1  ;;  %v1680_v27 = vpop.f32.mrb[19].mxu0 }
 0x12a   : > { %v1681_v28 = vadd.f32 %v1680_v27, %v1679_v23  ;;  %v1744_v29 = vpop.f32.mrb[19].mxu1 }
 0x12b   : > { %v1018_v30 = vadd.f32 %v1742_v25, %v1678_v21  ;;  %v1745_v31 = vadd.f32 %v1744_v29, %v1743_v26 }
 0x12d   : > { %v1187_v32 = vadd.f32 %v1186_v17, %v1018_v30  ;;  %v1212_v33 = vmul.f32 %v1018_v30, %v1018_v30  ;;  %v1021_v34 = vadd.f32 %v1745_v31, %v1681_v28 }
 0x12e   : > { %v1682_v35 = vpop.f32.mrb[20].mxu0 }
 0x12f   : > { %v1227_v36 = vadd.f32 %v1226_v24, %v1212_v33  ;;  %v1612_v37 = vpack.c.bf16 %v1021_v34, %v1018_v30  ;;  %v1188_v38 = vadd.f32 %v1187_v32, %v1021_v34  ;;  %v1213_v39 = vmul.f32 %v1021_v34, %v1021_v34  ;;  %v1746_v40 = vpop.f32.mrb[20].mxu1  ;;  %v1683_v41 = vpop.f32.mrb[21].mxu0 }
 0x130   : > { %v1684_v42 = vadd.f32 %v1683_v41, %v1682_v35  ;;  %v1747_v43 = vpop.f32.mrb[21].mxu1  ;;  %v1685_v44 = vpop.f32.mrb[22].mxu0 }
 0x131   : > { %1632 = vst [vmem:[%s2022_s29 + $0x20] sm:$0xff] %v1612_v37   ;;  %v1228_v45 = vadd.f32 %v1227_v36, %v1213_v39  ;;  %v1748_v46 = vadd.f32 %v1747_v43, %v1746_v40  ;;  %v1749_v47 = vpop.f32.mrb[22].mxu1  ;;  %v1686_v48 = vpop.f32.mrb[23].mxu0 }
 0x132   : > { %v1687_v49 = vadd.f32 %v1686_v48, %v1685_v44  ;;  %v1750_v50 = vpop.f32.mrb[23].mxu1  ;;  %v1179_v48 = vld [vmem:[#allocation3] sm:$0x1] }
 0x133   : > { %v1026_v51 = vadd.f32 %v1748_v46, %v1684_v42  ;;  %v1751_v52 = vadd.f32 %v1750_v50, %v1749_v47 }
 0x135   : > { %v1189_v53 = vadd.f32 %v1188_v38, %v1026_v51  ;;  %v1214_v54 = vmul.f32 %v1026_v51, %v1026_v51  ;;  %v1029_v55 = vadd.f32 %v1751_v52, %v1687_v49 }
 0x136   : > { %v1688_v56 = vpop.f32.mrb[24].mxu0 }
 0x137   : > { %v1229_v57 = vadd.f32 %v1228_v45, %v1214_v54  ;;  %v1617_v58 = vpack.c.bf16 %v1029_v55, %v1026_v51  ;;  %v1190_v59 = vadd.f32 %v1189_v53, %v1029_v55  ;;  %v1215_v60 = vmul.f32 %v1029_v55, %v1029_v55  ;;  %v1752_v61 = vpop.f32.mrb[24].mxu1  ;;  %v1689_v62 = vpop.f32.mrb[25].mxu0  ;;  %v1203_v51 = vld [vmem:[#allocation4] sm:$0x1] }
 0x138   : > { %v1690_v63 = vadd.f32 %v1689_v62, %v1688_v56  ;;  %v1753_v0 = vpop.f32.mrb[25].mxu1  ;;  %v1691_v1 = vpop.f32.mrb[26].mxu0 }
 0x139   : > { %1633 = vst [vmem:[%s2022_s29 + $0x28] sm:$0xff] %v1617_v58   ;;  %v1230_v2 = vadd.f32 %v1229_v57, %v1215_v60  ;;  %v1754_v3 = vadd.f32 %v1753_v0, %v1752_v61  ;;  %v1755_v4 = vpop.f32.mrb[26].mxu1  ;;  %v1692_v5 = vpop.f32.mrb[27].mxu0 }
 0x13a   : > { %v1693_v6 = vadd.f32 %v1692_v5, %v1691_v1  ;;  %v1756_v7 = vpop.f32.mrb[27].mxu1 }
 0x13b   : > { %v1034_v8 = vadd.f32 %v1754_v3, %v1690_v63  ;;  %v1757_v9 = vadd.f32 %v1756_v7, %v1755_v4 }
 0x13d   : > { %v1191_v10 = vadd.f32 %v1190_v59, %v1034_v8  ;;  %v1216_v11 = vmul.f32 %v1034_v8, %v1034_v8  ;;  %v1037_v12 = vadd.f32 %v1757_v9, %v1693_v6 }
 0x13e   : > { %v1694_v13 = vpop.f32.mrb[28].mxu0 }
 0x13f   : > { %v1231_v14 = vadd.f32 %v1230_v2, %v1216_v11  ;;  %v1622_v15 = vpack.c.bf16 %v1037_v12, %v1034_v8  ;;  %v1192_v16 = vadd.f32 %v1191_v10, %v1037_v12  ;;  %v1217_v17 = vmul.f32 %v1037_v12, %v1037_v12  ;;  %v1758_v18 = vpop.f32.mrb[28].mxu1  ;;  %v1695_v19 = vpop.f32.mrb[29].mxu0 }
 0x140   : > { %v1696_v20 = vadd.f32 %v1695_v19, %v1694_v13  ;;  %v1759_v21 = vpop.f32.mrb[29].mxu1  ;;  %v1697_v22 = vpop.f32.mrb[30].mxu0 }
 0x141   : > { %1634 = vst [vmem:[%s2022_s29 + $0x30] sm:$0xff] %v1622_v15   ;;  %v1232_v23 = vadd.f32 %v1231_v14, %v1217_v17  ;;  %v1760_v24 = vadd.f32 %v1759_v21, %v1758_v18  ;;  %v1761_v25 = vpop.f32.mrb[30].mxu1  ;;  %v1698_v26 = vpop.f32.mrb[31].mxu0 }
 0x142   : > { %v1699_v27 = vadd.f32 %v1698_v26, %v1697_v22  ;;  %v1762_v28 = vpop.f32.mrb[31].mxu1 }
 0x143   : > { %v1042_v29 = vadd.f32 %v1760_v24, %v1696_v20  ;;  %v1763_v30 = vadd.f32 %v1762_v28, %v1761_v25 }
 0x145   : > { %v1193_v31 = vadd.f32 %v1192_v16, %v1042_v29  ;;  %v1218_v32 = vmul.f32 %v1042_v29, %v1042_v29  ;;  %v1045_v33 = vadd.f32 %v1763_v30, %v1699_v27 }
 0x147   : > { %v1233_v34 = vadd.f32 %v1232_v23, %v1218_v32  ;;  %v1627_v35 = vpack.c.bf16 %v1045_v33, %v1042_v29  ;;  %v1194_v36 = vadd.f32 %v1193_v31, %v1045_v33  ;;  %v1219_v37 = vmul.f32 %v1045_v33, %v1045_v33 }
 0x149   : > { %1635 = vst [vmem:[%s2022_s29 + $0x38] sm:$0xff] %v1627_v35   ;;  %v1195_v38 = vrot.slane %v1194_v36, 4  ;;  %v1234_v39 = vadd.f32 %v1233_v34, %v1219_v37 }
 0x14b   : > { %v1196_v40 = vadd.f32 %v1195_v38, %v1194_v36  ;;  %v1235_v41 = vrot.slane %v1234_v39, 4 }
 0x14d   : > { %v1197_v42 = vrot.slane %v1196_v40, 2  ;;  %v1236_v43 = vadd.f32 %v1235_v41, %v1234_v39 }
 0x14f   : > { %v1198_v44 = vadd.f32 %v1197_v42, %v1196_v40  ;;  %v1237_v45 = vrot.slane %v1236_v43, 2 }
 0x151   : > { %v1199_v46 = vrot.slane %v1198_v44, 1  ;;  %v1238_v47 = vadd.f32 %v1237_v45, %v1236_v43 }
 0x153   : > { %v1200_v49 = vadd.f32 %v1199_v46, %v1198_v44  ;;  %v1239_v50 = vrot.slane %v1238_v47, 1 }
 0x155   : > { %v1201_v52 = vadd.f32 %v1200_v49, %v1179_v48  ;;  %v1240_v53 = vadd.f32 %v1239_v50, %v1238_v47 }
 0x157   : > { %1202 = vst [vmem:[#allocation3] sm:$0x1] %v1201_v52  ;;  %v1241_v54 = vadd.f32 %v1240_v53, %v1203_v51 }
 0x159   : > { %1242 = vst [vmem:[#allocation4] sm:$0x1] %v1241_v54 }
 0x15e   : > { %v1566_v55 = vld [vmem:[#allocation3] ss:$0 sm:$0xff] }
 0x15f   : > { %1252 = vst [vmem:[%s354_s7] sm:$0xff] %v1566_v55 }
 0x160   : > { %v1567_v56 = vld [vmem:[#allocation4] ss:$0 sm:$0xff] }
 0x161   : > { %1260 = vst [vmem:[%s361_s10] sm:$0xff] %v1567_v56 }
 0x162 PF: > { %s15_s17 = sadd.s32 1, %s1891_s17   ;;  %s2053_s15 = smov %s1887_s16 }
 0x163   : > { %p12_p5 = scmp.ge.s32.totalorder %s15_s17, 6   ;;  %s2054_s16 = smov %s2056_s18 }
 0x165   :  { %14 = sbr.rel (!%p12_p5) target bundleno = 2 (0x2), region = 101 }

// kernel: unet_block_innermost.5
= control target key start
LH: loop header
LB: loop body
LE: loop exit
PB: predicated region body
PF: predicated region fallthrough
CT: control target
= control target key end

     0   :  { %s513_s12 = smov 0   ;;  %s515_s13 = smov 0   ;;  %s580_s0 = inlined_call_operand.vmem [shape: bf16[4,128,128], index: 0, kind: input, shape index: {}]   ;;  %s581_s1 = inlined_call_operand.vmem [shape: f32[1,128], index: 1, kind: input, shape index: {}]   ;;  %s582_s2 = inlined_call_operand.vmem [shape: f32[1,128], index: 2, kind: input, shape index: {}]   ;;  %s583_s3 = inlined_call_operand.vmem [shape: f32[4,128,128], index: 3, kind: output, shape index: {}]  }
   0x1   :  { %s517_s14 = smov 0  }
   0x2 LB: > { %s25_s15 = sadd.s32 1, %s487_s13  ;;  %p395_p0 = scmp.ge.s32.totalorder %s491_s14, 1  ;;  %s491_s14 = sphi %s517_s14, %s13_s14   ;;  %s487_s13 = sphi %s515_s13, %s585_s13   ;;  %s483_s12 = sphi %s513_s12, %s584_s12  }
   0x3   : > { %p27_p1 = scmp.ge.s32.totalorder %s25_s15, 4  ;;  %p158_p2 = scmp.lt.s32.totalorder %s491_s14, 5 }
   0x5   : > { %s587_s15 = smov (%p27_p1, %s25_s15), 0  ;;  %p159_p3 = pnand %p395_p0, %p158_p2 }
   0x6   : > { %p191_p4 = scmp.lt.s32.totalorder (!%p159_p3), %s483_s12, 3  ;;  %v400_v0 = vld [vmem:[%s581_s1] ss:$0 sm:$0xff] (!%p159_p3) }
   0x7   : > { %162 = sbr.rel (%p159_p3) target bundleno = 34 (0x22), region = 32  ;;  %v401_v9 = vld [vmem:[%s582_s2] ss:$0 sm:$0xff] (!%p159_p3) }
   0xe   : > { %s589_s12 = smov (!%p191_p4, %s483_s12), 3 }
   0xf   : > { %s404_s16 = sshll.u32 %s589_s12, 6  ;;  %s405_s22 = sshll.u32 %s589_s12, 7 }
  0x10   : > { %s534_s19 = scalar_lea.vmem %s580_s0, %s404_s16  ;;  %s549_s27 = scalar_lea.vmem %s583_s3, %s405_s22 }
  0x11   : > { %v407_v1 = vld [vmem:[%s534_s19] sm:$0xff]   ;;  %v438_v2 = vld [vmem:[%s534_s19 + $0x8] sm:$0xff]   ;;  %v439_v3 = vld [vmem:[%s534_s19 + $0x10] sm:$0xff]  }
  0x12   : > { %v408_v4 = vunpack.c.l.bf16 %v407_v1  ;;  %v409_v5 = vunpack.c.h.bf16 %v407_v1  ;;  %v412_v6 = vunpack.c.l.bf16 %v438_v2  ;;  %v413_v7 = vunpack.c.h.bf16 %v438_v2  ;;  %v440_v8 = vld [vmem:[%s534_s19 + $0x18] sm:$0xff]   ;;  %v441_v22 = vld [vmem:[%s534_s19 + $0x20] sm:$0xff]   ;;  %v442_v23 = vld [vmem:[%s534_s19 + $0x28] sm:$0xff]  }
  0x13   : > { %v416_v10 = vunpack.c.l.bf16 %v439_v3  ;;  %v417_v11 = vunpack.c.h.bf16 %v439_v3  ;;  %v420_v12 = vunpack.c.l.bf16 %v440_v8  ;;  %v421_v13 = vunpack.c.h.bf16 %v440_v8  ;;  %v443_v28 = vld [vmem:[%s534_s19 + $0x30] sm:$0xff]   ;;  %v444_v29 = vld [vmem:[%s534_s19 + $0x38] sm:$0xff]  }
  0x14   : > { %v249_v14 = vmul.f32 %v408_v4, %v400_v0  ;;  %v250_v15 = vmul.f32 %v409_v5, %v400_v0  ;;  %v251_v16 = vmul.f32 %v412_v6, %v400_v0  ;;  %v252_v17 = vmul.f32 %v413_v7, %v400_v0 }
  0x15   : > { %v253_v18 = vmul.f32 %v416_v10, %v400_v0  ;;  %v254_v19 = vmul.f32 %v417_v11, %v400_v0  ;;  %v255_v20 = vmul.f32 %v420_v12, %v400_v0  ;;  %v256_v21 = vmul.f32 %v421_v13, %v400_v0 }
  0x16   : > { %v272_v24 = vadd.f32 %v401_v9, %v249_v14  ;;  %v273_v25 = vadd.f32 %v401_v9, %v250_v15  ;;  %v274_v26 = vadd.f32 %v401_v9, %v251_v16  ;;  %v275_v27 = vadd.f32 %v401_v9, %v252_v17 }
  0x17   : > { %v276_v30 = vadd.f32 %v401_v9, %v253_v18  ;;  %v277_v31 = vadd.f32 %v401_v9, %v254_v19  ;;  %v278_v32 = vadd.f32 %v401_v9, %v255_v20  ;;  %v279_v33 = vadd.f32 %v401_v9, %v256_v21 }
  0x18   : > { %288 = vst [vmem:[%s549_s27] sm:$0xff] %v272_v24  ;;  %289 = vst [vmem:[%s549_s27 + $0x8] sm:$0xff] %v273_v25  ;;  %v424_v34 = vunpack.c.l.bf16 %v441_v22  ;;  %v425_v35 = vunpack.c.h.bf16 %v441_v22  ;;  %v428_v36 = vunpack.c.l.bf16 %v442_v23  ;;  %v429_v37 = vunpack.c.h.bf16 %v442_v23 }
  0x19   : > { %290 = vst [vmem:[%s549_s27 + $0x10] sm:$0xff] %v274_v26  ;;  %291 = vst [vmem:[%s549_s27 + $0x18] sm:$0xff] %v275_v27  ;;  %v432_v38 = vunpack.c.l.bf16 %v443_v28  ;;  %v433_v39 = vunpack.c.h.bf16 %v443_v28  ;;  %v436_v40 = vunpack.c.l.bf16 %v444_v29  ;;  %v437_v41 = vunpack.c.h.bf16 %v444_v29 }
  0x1a   : > { %292 = vst [vmem:[%s549_s27 + $0x20] sm:$0xff] %v276_v30  ;;  %293 = vst [vmem:[%s549_s27 + $0x28] sm:$0xff] %v277_v31  ;;  %v257_v42 = vmul.f32 %v424_v34, %v400_v0  ;;  %v258_v43 = vmul.f32 %v425_v35, %v400_v0  ;;  %v259_v44 = vmul.f32 %v428_v36, %v400_v0 }
  0x1b   : > { %294 = vst [vmem:[%s549_s27 + $0x30] sm:$0xff] %v278_v32  ;;  %295 = vst [vmem:[%s549_s27 + $0x38] sm:$0xff] %v279_v33  ;;  %v260_v45 = vmul.f32 %v429_v37, %v400_v0  ;;  %v261_v46 = vmul.f32 %v432_v38, %v400_v0  ;;  %v262_v47 = vmul.f32 %v433_v39, %v400_v0 }
  0x1c   : > { %v263_v48 = vmul.f32 %v436_v40, %v400_v0  ;;  %v264_v49 = vmul.f32 %v437_v41, %v400_v0  ;;  %v280_v50 = vadd.f32 %v401_v9, %v257_v42  ;;  %v281_v51 = vadd.f32 %v401_v9, %v258_v43 }
  0x1d   : > { %v282_v52 = vadd.f32 %v401_v9, %v259_v44  ;;  %v283_v53 = vadd.f32 %v401_v9, %v260_v45  ;;  %v284_v54 = vadd.f32 %v401_v9, %v261_v46  ;;  %v285_v55 = vadd.f32 %v401_v9, %v262_v47 }
  0x1e   : > { %v286_v56 = vadd.f32 %v401_v9, %v263_v48  ;;  %v287_v57 = vadd.f32 %v401_v9, %v264_v49  ;;  %296 = vst [vmem:[%s549_s27 + $0x40] sm:$0xff] %v280_v50  ;;  %297 = vst [vmem:[%s549_s27 + $0x48] sm:$0xff] %v281_v51 }
  0x1f   : > { %298 = vst [vmem:[%s549_s27 + $0x50] sm:$0xff] %v282_v52  ;;  %299 = vst [vmem:[%s549_s27 + $0x58] sm:$0xff] %v283_v53 }
  0x20   : > { %300 = vst [vmem:[%s549_s27 + $0x60] sm:$0xff] %v284_v54  ;;  %301 = vst [vmem:[%s549_s27 + $0x68] sm:$0xff] %v285_v55 }
  0x21   : > { %302 = vst [vmem:[%s549_s27 + $0x70] sm:$0xff] %v286_v56  ;;  %303 = vst [vmem:[%s549_s27 + $0x78] sm:$0xff] %v287_v57 }
  0x22 PF: > { %s13_s14 = sadd.s32 1, %s491_s14   ;;  %s584_s12 = smov %s487_s13 }
  0x23   : > { %p10_p5 = scmp.ge.s32.totalorder %s13_s14, 6   ;;  %s585_s13 = smov %s587_s15 }
  0x25   :  { %12 = sbr.rel (!%p10_p5) target bundleno = 2 (0x2), region = 62 }

</bundles_post_ra>
